<compile_context>
chip_gen: v7x
topology: tpu7x:2x2x1
jax: 0.10.0
libtpu: 0.0.40
codegen_flags: <defaults>
</compile_context>

<pallas_src>
import functools
import math

import jax
import jax.numpy as jnp
from jax.experimental import pallas as pl
from jax.experimental.pallas import tpu as pltpu

LANE = 128
MAX_TILE_B = 2048  # streaming roofline plateaus ~1-2k rows; multiple of 16


def _round_up(x, m):
    return ((x + m - 1) // m) * m


# ---------------------------------------------------------------------------
# Pallas kernel: one batch tile of the full actor forward
#   (3 bf16 matmuls on the MXU + ReLU on the VPU + tanh on the EUP).
# ---------------------------------------------------------------------------
def _actor_kernel(obs_ref, w_ref, b_ref, out_ref, *, act_limit, k1):
    # obs_ref: (tile_b, obs_dim) f32 — raw, un-padded observations
    # w_ref:   (3, P, P) bf16, [W1, W2, Wmu]; W1 lives in rows [0:obs_dim)
    # b_ref:   (3, 1, P) f32,  [b1, b2, bmu]
    # out_ref: (tile_b, P) bf16
    x = obs_ref[...].astype(jnp.bfloat16)          # cast on VPU (free; VALU slack)
    obs_dim = x.shape[-1]
    if obs_dim < k1:                               # trace-time zero-extend to the
        x = jnp.concatenate(                       # sublane-packed K of the W1 slice
            [x, jnp.zeros((x.shape[0], k1 - obs_dim), jnp.bfloat16)], axis=-1)

    # hidden layer 1: ReLU(x @ W1 + b1)   (bf16 operands, f32 accumulate)
    w1 = w_ref[0][:k1, :]
    h = jnp.dot(x, w1, preferred_element_type=jnp.float32) + b_ref[0]
    h = jnp.maximum(h, 0.0)

    # hidden layer 2: ReLU(h @ W2 + b2)   (output_activation == activation)
    h = jnp.dot(h.astype(jnp.bfloat16), w_ref[1],
                preferred_element_type=jnp.float32) + b_ref[1]
    h = jnp.maximum(h, 0.0)

    # mu head, squash, scale (tanh in f32, store bf16)
    mu = jnp.dot(h.astype(jnp.bfloat16), w_ref[2],
                 preferred_element_type=jnp.float32) + b_ref[2]
    out_ref[...] = (act_limit * jnp.tanh(mu)).astype(out_ref.dtype)


# ---------------------------------------------------------------------------
# Wrapper: single pallas_call; batch tiled only when it exceeds MAX_TILE_B.
# ---------------------------------------------------------------------------
@functools.partial(jax.jit, static_argnames=("act_limit", "act_dim"))
def actor_forward(obs, w_slab, b_slab, act_limit, act_dim):
    B, obs_dim = obs.shape
    P = w_slab.shape[-1]
    k1 = min(P, _round_up(obs_dim, 16))  # sublane-packed K for layer 1

    if B <= MAX_TILE_B:
        # Single grid step; full-extent blocks need no divisibility / padding.
        tile_b, b_pad, obs_in = B, B, obs
    else:
        tile_b = MAX_TILE_B
        b_pad = _round_up(B, tile_b)
        obs_in = jnp.zeros((b_pad, obs_dim), obs.dtype).at[:B].set(obs)

    kernel = functools.partial(_actor_kernel, act_limit=float(act_limit), k1=k1)

    out = pl.pallas_call(
        kernel,
        out_shape=jax.ShapeDtypeStruct((b_pad, P), jnp.bfloat16),
        grid=(pl.cdiv(b_pad, tile_b),),
        in_specs=[
            pl.BlockSpec((tile_b, obs_dim), lambda i: (i, 0)),   # raw obs tile
            pl.BlockSpec(w_slab.shape, lambda i: (0, 0, 0)),     # weights (resident)
            pl.BlockSpec(b_slab.shape, lambda i: (0, 0, 0)),     # biases (resident)
        ],
        out_specs=pl.BlockSpec((tile_b, P), lambda i: (i, 0)),
        compiler_params=pltpu.CompilerParams(
            dimension_semantics=("parallel",)),
    )(obs_in, w_slab, b_slab)

    # Tiny slice of real lanes; upcast here so callers see f32 actions.
    return out[:B, :act_dim].astype(jnp.float32)


# ---------------------------------------------------------------------------
# Parameter construction (PyTorch nn.Linear-style uniform init) and packing.
# Weights stored as [in, out]; biases as [1, out].
# ---------------------------------------------------------------------------
def _linear_init(key, fan_in, fan_out):
    kw, kb = jax.random.split(key)
    bound = 1.0 / math.sqrt(fan_in)
    w = jax.random.uniform(kw, (fan_in, fan_out), jnp.float32, -bound, bound)
    b = jax.random.uniform(kb, (1, fan_out), jnp.float32, -bound, bound)
    return w, b


def make_actor_params(key, obs_dim, act_dim, hidden_sizes):
    k1, k2, k3 = jax.random.split(key, 3)
    h1, h2 = hidden_sizes
    w1, b1 = _linear_init(k1, obs_dim, h1)
    w2, b2 = _linear_init(k2, h1, h2)
    wmu, bmu = _linear_init(k3, h2, act_dim)
    return (w1, b1, w2, b2, wmu, bmu)


def pack_actor_params(params):
    """Zero-pad each layer to PxP lanes and stack into 2 resident operands.

    Zero padding keeps the math exact: unused input rows / output columns are
    zero and the padded output lanes are sliced off in the wrapper.
    """
    w1, b1, w2, b2, wmu, bmu = params
    dims = [w1.shape[0], w1.shape[1], w2.shape[1], wmu.shape[1]]
    P = _round_up(max(dims), LANE)

    def pad_w(w):
        return jnp.zeros((P, P), jnp.float32).at[: w.shape[0], : w.shape[1]].set(w)

    def pad_b(b):
        return jnp.zeros((1, P), jnp.float32).at[:, : b.shape[1]].set(b)

    w_slab = jnp.stack([pad_w(w1), pad_w(w2), pad_w(wmu)]).astype(jnp.bfloat16)
    b_slab = jnp.stack([pad_b(b1), pad_b(b2), pad_b(bmu)])  # keep f32 for the adds
    return w_slab, b_slab, P


class MLPActorCriticPallas:
    """Mirror of MLPActorCritic.forward: returns (action, None, None)."""

    def __init__(self, obs_dim, act_dim, hidden_sizes, act_limit, key):
        self.act_limit = float(act_limit)
        self.act_dim = int(act_dim)
        self.params = make_actor_params(key, obs_dim, act_dim, hidden_sizes)
        # Pre-pack/cast once; repeated per-step calls reuse the packed slabs
        # (and the jit-cached kernel) instead of re-streaming 7 tiny operands.
        self.w_slab, self.b_slab, self._padded = pack_actor_params(self.params)

    def forward(self, obs):
        a = actor_forward(obs, self.w_slab, self.b_slab,
                          self.act_limit, self.act_dim)
        return (a, None, None)


# ---------------------------------------------------------------------------
# Pure-JAX f32 reference for correctness check.
# ---------------------------------------------------------------------------
def _ref_forward(obs, params, act_limit):
    w1, b1, w2, b2, wmu, bmu = params
    h = jnp.maximum(obs @ w1 + b1, 0.0)
    h = jnp.maximum(h @ w2 + b2, 0.0)
    return act_limit * jnp.tanh(h @ wmu + bmu)


if __name__ == "__main__":
    key = jax.random.PRNGKey(0)
    k_obs, k_params = jax.random.split(key)

    # Small shapes consistent with the module (drone obs, 4 motors).
    batch, obs_dim, act_dim = 8, 16, 4
    hidden_sizes = (64, 64)
    act_limit = 1.0

    obs = jax.random.normal(k_obs, (batch, obs_dim), dtype=jnp.float32)

    ac = MLPActorCriticPallas(obs_dim, act_dim, hidden_sizes, act_limit, k_params)

    a, v, logp = ac.forward(obs)
    a = jax.block_until_ready(a)

    ref = _ref_forward(obs, ac.params, act_limit)
    assert a.shape == (batch, act_dim)
    assert v is None and logp is None
    # bf16 matmul operands / activations / output (f32 accumulate, f32 bias+tanh)
    # -> small tolerance vs the f32 reference; acceptable for RL control actions.
    assert jnp.allclose(a, ref, atol=3e-2), "mismatch vs pure-JAX reference"

    print("KERNEL_OK")
</pallas_src>

<mosaic_0001>
module attributes {stable_mosaic.version = 11 : i64} {
  func.func @_actor_kernel(%arg0: i32, %arg1: memref<8x16xf32, #tpu.memory_space<vmem>>, %arg2: memref<3x128x128xbf16, #tpu.memory_space<vmem>>, %arg3: memref<3x1x128xf32, #tpu.memory_space<vmem>>, %arg4: memref<8x128xbf16, #tpu.memory_space<vmem>>) attributes {dimension_semantics = [#tpu.dimension_semantics<parallel>], iteration_bounds = array<i64: 1>, scalar_prefetch = 0 : i64, scratch_operands = 0 : i64, tpu.core_type = #tpu.core_type<tc>, window_params = [{transform_indices = @transform_0, window_bounds = array<i64: 8, 16>}, {pipeline_mode = #tpu.pipeline_mode<synchronous>, transform_indices = @transform_1, window_bounds = array<i64: 3, 128, 128>}, {pipeline_mode = #tpu.pipeline_mode<synchronous>, transform_indices = @transform_2, window_bounds = array<i64: 3, 1, 128>}, {transform_indices = @transform_3, window_bounds = array<i64: 8, 128>}]} {
    %c0 = arith.constant 0 : index
    %c0_0 = arith.constant 0 : index
    %0 = vector.load %arg1[%c0, %c0_0] : memref<8x16xf32, #tpu.memory_space<vmem>>, vector<8x16xf32>
    %1 = arith.truncf %0 : vector<8x16xf32> to vector<8x16xbf16>
    %c0_1 = arith.constant 0 : index
    %c0_2 = arith.constant 0 : index
    %c0_3 = arith.constant 0 : index
    %2 = vector.load %arg2[%c0_1, %c0_2, %c0_3] : memref<3x128x128xbf16, #tpu.memory_space<vmem>>, vector<1x128x128xbf16>
    %3 = vector.shape_cast %2 : vector<1x128x128xbf16> to vector<128x128xbf16>
    %4 = vector.extract_strided_slice %3 {offsets = [0, 0], sizes = [16, 128], strides = [1, 1]} : vector<128x128xbf16> to vector<16x128xbf16>
    %cst = arith.constant dense<0.000000e+00> : vector<8x128xf32>
    %5 = tpu.matmul %1, %4, %cst {dimension_numbers = #tpu.dot_dimension_numbers<[1], [0], [0], [1], [0, 0, 1, 1], [], []>} : vector<8x16xbf16>, vector<16x128xbf16>, vector<8x128xf32> -> vector<8x128xf32>
    %c0_4 = arith.constant 0 : index
    %c0_5 = arith.constant 0 : index
    %c0_6 = arith.constant 0 : index
    %6 = vector.load %arg3[%c0_4, %c0_5, %c0_6] : memref<3x1x128xf32, #tpu.memory_space<vmem>>, vector<1x1x128xf32>
    %7 = vector.shape_cast %6 : vector<1x1x128xf32> to vector<1x128xf32>
    %8 = vector.broadcast %7 : vector<1x128xf32> to vector<8x128xf32>
    %9 = arith.addf %5, %8 : vector<8x128xf32>
    %cst_7 = arith.constant 0.000000e+00 : f32
    %10 = vector.broadcast %cst_7 : f32 to vector<8x128xf32>
    %11 = arith.maximumf %9, %10 : vector<8x128xf32>
    %12 = arith.truncf %11 : vector<8x128xf32> to vector<8x128xbf16>
    %c1 = arith.constant 1 : index
    %c0_8 = arith.constant 0 : index
    %c0_9 = arith.constant 0 : index
    %13 = vector.load %arg2[%c1, %c0_8, %c0_9] : memref<3x128x128xbf16, #tpu.memory_space<vmem>>, vector<1x128x128xbf16>
    %14 = vector.shape_cast %13 : vector<1x128x128xbf16> to vector<128x128xbf16>
    %cst_10 = arith.constant dense<0.000000e+00> : vector<8x128xf32>
    %15 = tpu.matmul %12, %14, %cst_10 {dimension_numbers = #tpu.dot_dimension_numbers<[1], [0], [0], [1], [0, 0, 1, 1], [], []>} : vector<8x128xbf16>, vector<128x128xbf16>, vector<8x128xf32> -> vector<8x128xf32>
    %c1_11 = arith.constant 1 : index
    %c0_12 = arith.constant 0 : index
    %c0_13 = arith.constant 0 : index
    %16 = vector.load %arg3[%c1_11, %c0_12, %c0_13] : memref<3x1x128xf32, #tpu.memory_space<vmem>>, vector<1x1x128xf32>
    %17 = vector.shape_cast %16 : vector<1x1x128xf32> to vector<1x128xf32>
    %18 = vector.broadcast %17 : vector<1x128xf32> to vector<8x128xf32>
    %19 = arith.addf %15, %18 : vector<8x128xf32>
    %cst_14 = arith.constant 0.000000e+00 : f32
    %20 = vector.broadcast %cst_14 : f32 to vector<8x128xf32>
    %21 = arith.maximumf %19, %20 : vector<8x128xf32>
    %22 = arith.truncf %21 : vector<8x128xf32> to vector<8x128xbf16>
    %c2 = arith.constant 2 : index
    %c0_15 = arith.constant 0 : index
    %c0_16 = arith.constant 0 : index
    %23 = vector.load %arg2[%c2, %c0_15, %c0_16] : memref<3x128x128xbf16, #tpu.memory_space<vmem>>, vector<1x128x128xbf16>
    %24 = vector.shape_cast %23 : vector<1x128x128xbf16> to vector<128x128xbf16>
    %cst_17 = arith.constant dense<0.000000e+00> : vector<8x128xf32>
    %25 = tpu.matmul %22, %24, %cst_17 {dimension_numbers = #tpu.dot_dimension_numbers<[1], [0], [0], [1], [0, 0, 1, 1], [], []>} : vector<8x128xbf16>, vector<128x128xbf16>, vector<8x128xf32> -> vector<8x128xf32>
    %c2_18 = arith.constant 2 : index
    %c0_19 = arith.constant 0 : index
    %c0_20 = arith.constant 0 : index
    %26 = vector.load %arg3[%c2_18, %c0_19, %c0_20] : memref<3x1x128xf32, #tpu.memory_space<vmem>>, vector<1x1x128xf32>
    %27 = vector.shape_cast %26 : vector<1x1x128xf32> to vector<1x128xf32>
    %28 = vector.broadcast %27 : vector<1x128xf32> to vector<8x128xf32>
    %29 = arith.addf %25, %28 : vector<8x128xf32>
    %30 = math.tanh %29 : vector<8x128xf32>
    %cst_21 = arith.constant 1.000000e+00 : f32
    %31 = vector.broadcast %cst_21 : f32 to vector<8x128xf32>
    %32 = arith.mulf %31, %30 : vector<8x128xf32>
    %33 = arith.truncf %32 : vector<8x128xf32> to vector<8x128xbf16>
    %c0_22 = arith.constant 0 : index
    %c0_23 = arith.constant 0 : index
    %34 = vector.load %arg4[%c0_22, %c0_23] : memref<8x128xbf16, #tpu.memory_space<vmem>>, vector<8x128xbf16>
    tpu.vector_store %arg4[%c0_22, %c0_23], %33 {strides = array<i32>} : memref<8x128xbf16, #tpu.memory_space<vmem>>, vector<8x128xbf16>,
    return
  }
  func.func @transform_0(%arg0: i32) -> (i32, i32) {
    %c0_i32 = arith.constant 0 : i32
    %c0_i32_0 = arith.constant 0 : i32
    return %arg0, %c0_i32 : i32, i32
  }
  func.func @transform_1(%arg0: i32) -> (i32, i32, i32) {
    %c0_i32 = arith.constant 0 : i32
    %c0_i32_0 = arith.constant 0 : i32
    %c0_i32_1 = arith.constant 0 : i32
    %c0_i32_2 = arith.constant 0 : i32
    return %c0_i32, %c0_i32_0, %c0_i32_1 : i32, i32, i32
  }
  func.func @transform_2(%arg0: i32) -> (i32, i32, i32) {
    %c0_i32 = arith.constant 0 : i32
    %c0_i32_0 = arith.constant 0 : i32
    %c0_i32_1 = arith.constant 0 : i32
    %c0_i32_2 = arith.constant 0 : i32
    return %c0_i32, %c0_i32_0, %c0_i32_1 : i32, i32, i32
  }
  func.func @transform_3(%arg0: i32) -> (i32, i32) {
    %c0_i32 = arith.constant 0 : i32
    %c0_i32_0 = arith.constant 0 : i32
    return %arg0, %c0_i32 : i32, i32
  }
}

</mosaic_0001>

<bundles_post_ra>
// kernel: actor_forward.1
= control target key start
LH: loop header
LB: loop body
LE: loop exit
PB: predicated region body
PF: predicated region fallthrough
CT: control target
= control target key end

     0   :  { %8 = vsyncpa [#allocation3], 0  ;;  %s592_s0 = inlined_call_operand.hbm [shape: f32[8,16], index: 0, kind: input, shape index: {}]   ;;  %s593_s1 = inlined_call_operand.hbm [shape: bf16[3,128,128], index: 1, kind: input, shape index: {}]   ;;  %s594_s2 = inlined_call_operand.vmem [shape: f32[3,1,128], index: 2, kind: input, shape index: {}]   ;;  %s595_s3 = inlined_call_operand.vmem [shape: bf16[8,128], index: 3, kind: output, shape index: {}]  }
   0x1   :  { %9 = vsyncpa [#allocation5], 0  ;;  %s503_s12 = smov [#allocation2]   ;;  %s504_s14 = smov [#allocation4]  }
   0x2   :  { %s16_s13 = sshll.u32 %s503_s12, 4  ;;  %s25_s15 = sshll.u32 %s504_s14, 4  ;;  %s17_s13 = int_to_ptr.vmem [resolvable:$true] %s16_s13  ;;  %s529_s15 = int_to_ptr.vmem [resolvable:$true] %s25_s15 }
   0x3   :  { %s455_s18 = scalar_lea.hbm %s592_s0, 128 }
   0x4   :  { %p456_p0 = scmp.ne.s32.totalorder %s592_s0, %s455_s18  ;;  %p459_p1 = scmp.lt.u32.totalorder %s455_s18, %s592_s0 }
   0x6   :  { %p461_p2 = pnand %p459_p1, %p456_p0 }
   0x8   :  { %464 = shalt.err (!%p461_p2)
}
   0x9   :  { %s465_s23 = scalar_lea.vmem %s17_s13, 128  ;;  %p470_p4 = scmp.lt.s32.totalorder %s17_s13, %s17_s13 }
   0xa   :  { %p466_p3 = scmp.ne.s32.totalorder %s17_s13, %s465_s23  ;;  %p471_p5 = scmp.lt.s32.totalorder %s465_s23, %s465_s23 }
   0xc   :  { %p472_p6 = por %p471_p5, %p470_p4 }
   0xe   :  { %p473_p7 = pnand %p472_p6, %p466_p3 }
  0x10   :  { %476 = shalt.err (!%p473_p7)
}
  0x11   :  { %19 = dma.hbm_to_vmem [thread:$0]  %s592_s0, 128, %s17_s13, [#allocation3]  }
  0x12   :  { %s477_s28 = scalar_lea.hbm %s593_s1, 3072 }
  0x13   :  { %p478_p8 = scmp.ne.s32.totalorder %s593_s1, %s477_s28  ;;  %p481_p9 = scmp.lt.u32.totalorder %s477_s28, %s593_s1 }
  0x15   :  { %p483_p10 = pnand %p481_p9, %p478_p8 }
  0x17   :  { %486 = shalt.err (!%p483_p10)
}
  0x18   :  { %s487_s6 = scalar_lea.vmem %s529_s15, 3072  ;;  %p492_p12 = scmp.lt.s32.totalorder %s529_s15, %s529_s15 }
  0x19   :  { %p488_p11 = scmp.ne.s32.totalorder %s529_s15, %s487_s6  ;;  %p493_p13 = scmp.lt.s32.totalorder %s487_s6, %s487_s6 }
  0x1b   :  { %p494_p0 = por %p493_p13, %p492_p12 }
  0x1d   :  { %p495_p1 = pnand %p494_p0, %p488_p11 }
  0x1f   :  { %498 = shalt.err (!%p495_p1)
}
  0x20   :  { %s505_s0 = smov 64   ;;  %s506_s7 = smov 4  }
  0x21   :  { %31 = dma.hbm_to_vmem [thread:$0]  %s593_s1, 3072, %s529_s15, [#allocation5], %s505_s0, %s505_s0, %s506_s7  }
  0x22   :  { %499 = dma.done.wait [#allocation3], 128  }
  0x23   :  { %500 = vsyncadd [#allocation3], 4294967168 }
  0x24   :  { %501 = dma.done.wait [#allocation5], 3072  }
  0x25   :  { %502 = vsyncadd [#allocation5], 4294964224  ;;  %v507_v0 = vmov 0.0   ;;  %vm508_vm0 = vmmov 0   ;;  %v436_v1 = vld [vmem:[#allocation4] sm:$0xff]   ;;  %v41_v2 = vld [vmem:[#allocation2] sm:$0xff] }
  0x26   :  { %384 = vmatprep.subr.bf16.mxu0 %v507_v0  ;;  %386 = vmatprep.mubr.msk.bf16.mxu0 %vm508_vm0, %v507_v0  ;;  %v42_v3 = vpack.c.bf16 %v41_v2, %v41_v2  ;;  %vm58_vm1 = vcmask 130048   ;;  %v437_v4 = vld [vmem:[#allocation4 + $0x40] sm:$0xff]   ;;  %v438_v5 = vld [vmem:[#allocation4 + $0x48] sm:$0xff]   ;;  %v439_v6 = vld [vmem:[#allocation4 + $0x50] sm:$0xff]  }
  0x27   :  { %390 = vmatprep.subr.bf16.mxu1 %v507_v0  ;;  %406 = vmatprep.mubr.msk.bf16.mxu1 %vm508_vm0, %v507_v0  ;;  %v440_v7 = vld [vmem:[#allocation4 + $0x58] sm:$0xff]   ;;  %v441_v8 = vld [vmem:[#allocation4 + $0x60] sm:$0xff]   ;;  %v442_v9 = vld [vmem:[#allocation4 + $0x68] sm:$0xff]  }
  0x28   :  { %385 = vmatpush3.bf16.msra.mxu0 %v436_v1  ;;  %391 = vmatpush3.bf16.msra.mxu1 %v437_v4  ;;  %v443_v10 = vld [vmem:[#allocation4 + $0x70] sm:$0xff]   ;;  %v444_v11 = vld [vmem:[#allocation4 + $0x78] sm:$0xff]   ;;  %v445_v12 = vld [vmem:[#allocation4 + $0x80] sm:$0xff]  }
  0x29   :  { %410 = vmatprep.subr.bf16.mxu0 %v507_v0  ;;  %392 = vmatprep.subr.bf16.mxu1 %v507_v0  ;;  %v446_v13 = vld [vmem:[#allocation4 + $0x88] sm:$0xff]   ;;  %v447_v14 = vld [vmem:[#allocation4 + $0x90] sm:$0xff]   ;;  %v448_v15 = vld [vmem:[#allocation4 + $0x98] sm:$0xff]  }
  0x2a   :  { %v449_v16 = vld [vmem:[#allocation4 + $0xa0] sm:$0xff]   ;;  %v450_v17 = vld [vmem:[#allocation4 + $0xa8] sm:$0xff]   ;;  %v341_v18 = vld [vmem:[%s594_s2] ss:$0 sm:$0xff] }
  0x2b   :  { %387 = vmatmul.mubr.msk.bf16.vlgmr.msra.gmra.mrb[0].mxu0 %vm58_vm1, %v42_v3  ;;  %v451_v26 = vld [vmem:[#allocation4 + $0xb0] sm:$0xff]   ;;  %v452_v27 = vld [vmem:[#allocation4 + $0xb8] sm:$0xff]  }
  0x2c   :  { %426 = vmatprep.mubr.msk.bf16.mxu0 %vm508_vm0, %v507_v0  ;;  %393 = vmatpush3.bf16.msra.mxu1 %v438_v5  ;;  %v345_v28 = vld [vmem:[%s594_s2 + $0x1] ss:$0 sm:$0xff]  ;;  %v355_v36 = vld [vmem:[%s594_s2 + $0x2] ss:$0 sm:$0xff] }
  0x2d   :  { %394 = vmatprep.subr.bf16.mxu1 %v507_v0  ;;  %411 = vmatpush3.bf16.msra.mxu0 %v445_v12 }
  0x2e   :  { %412 = vmatprep.subr.bf16.mxu0 %v507_v0 }
  0x30   :  { %395 = vmatpush3.bf16.msra.mxu1 %v439_v6 }
  0x31   :  { %396 = vmatprep.subr.bf16.mxu1 %v507_v0  ;;  %413 = vmatpush3.bf16.msra.mxu0 %v446_v13 }
  0x32   :  { %414 = vmatprep.subr.bf16.mxu0 %v507_v0 }
  0x34   :  { %397 = vmatpush3.bf16.msra.mxu1 %v440_v7 }
  0x35   :  { %398 = vmatprep.subr.bf16.mxu1 %v507_v0  ;;  %415 = vmatpush3.bf16.msra.mxu0 %v447_v14 }
  0x36   :  { %416 = vmatprep.subr.bf16.mxu0 %v507_v0 }
  0x38   :  { %399 = vmatpush3.bf16.msra.mxu1 %v441_v8 }
  0x39   :  { %400 = vmatprep.subr.bf16.mxu1 %v507_v0  ;;  %417 = vmatpush3.bf16.msra.mxu0 %v448_v15 }
  0x3a   :  { %418 = vmatprep.subr.bf16.mxu0 %v507_v0 }
  0x3c   :  { %401 = vmatpush3.bf16.msra.mxu1 %v442_v9 }
  0x3d   :  { %402 = vmatprep.subr.bf16.mxu1 %v507_v0  ;;  %419 = vmatpush3.bf16.msra.mxu0 %v449_v16 }
  0x3e   :  { %420 = vmatprep.subr.bf16.mxu0 %v507_v0 }
  0x40   :  { %403 = vmatpush3.bf16.msra.mxu1 %v443_v10 }
  0x41   :  { %404 = vmatprep.subr.bf16.mxu1 %v507_v0  ;;  %421 = vmatpush3.bf16.msra.mxu0 %v450_v17 }
  0x42   :  { %422 = vmatprep.subr.bf16.mxu0 %v507_v0 }
  0x44   :  { %405 = vmatpush3.bf16.msra.mxu1 %v444_v11 }
  0x45   :  { %423 = vmatpush3.bf16.msra.mxu0 %v451_v26 }
  0x46   :  { %424 = vmatprep.subr.bf16.mxu0 %v507_v0 }
  0x49   :  { %425 = vmatpush3.bf16.msra.mxu0 %v452_v27 }
  0xfe   :  { %v96_v19 = vpop.f32.mrb[0].mxu0 }
  0xff   :  { %v97_v20 = vadd.f32 %v341_v18, %v96_v19  ;;  %v388_v21 = vpop.f32.mrb[1].mxu0 }
 0x100   :  { %v99_v22 = vpop.f32.mrb[2].mxu0 }
 0x101   :  { %v102_v23 = vmax.f32 %v97_v20, 0.0  ;;  %v389_v24 = vpop.f32.mrb[3].mxu0 }
 0x103   :  { %v103_v25 = vpack.c.bf16 %v102_v23, %v102_v23 }
 0x105   :  { %407 = vmatmul.mubr.bf16.vlgmr.msra.gmra.mrb[0].mxu1 %v103_v25 }
 0x1d8   :  { %v211_v29 = vpop.f32.mrb[0].mxu1 }
 0x1d9   :  { %v212_v30 = vadd.f32 %v345_v28, %v211_v29  ;;  %v408_v31 = vpop.f32.mrb[1].mxu1 }
 0x1da   :  { %v214_v32 = vpop.f32.mrb[2].mxu1 }
 0x1db   :  { %v217_v33 = vmax.f32 %v212_v30, 0.0  ;;  %v409_v34 = vpop.f32.mrb[3].mxu1 }
 0x1dd   :  { %v218_v35 = vpack.c.bf16 %v217_v33, %v217_v33 }
 0x1df   :  { %427 = vmatmul.mubr.bf16.vlgmr.msra.gmra.mrb[4].mxu0 %v218_v35 }
 0x2b2   :  { %v326_v37 = vpop.f32.mrb[4].mxu0 }
 0x2b3   :  { %v327_v38 = vadd.f32 %v355_v36, %v326_v37  ;;  %v428_v39 = vpop.f32.mrb[5].mxu0 }
 0x2b4   :  { %v329_v40 = vpop.f32.mrb[6].mxu0 }
 0x2b5   :  { %453 = vtanh.f32 %v327_v38  ;;  %v429_v41 = vpop.f32.mrb[7].mxu0 }
 0x2bf   :  { %v454_v42 = vpop.eup %453 }
 0x2c0   :  { %v333_v43 = vpack.c.bf16 %v454_v42, %v454_v42 }
 0x2c2   :  { %334 = vst [vmem:[%s595_s3] sm:$0xf] %v333_v43 }
 0x2c3   :  { %339 = vsyncpa [#allocation3], 1 }
 0x2c4   :  { %340 = vsyncpa [#allocation5], 1 }

</bundles_post_ra>
